<compile_context>
chip_gen: v7x
topology: tpu7x:2x2x1
jax: 0.10.0
libtpu: 0.0.40
codegen_flags: <defaults>
</compile_context>

<pallas_src>
import functools

import jax
import jax.numpy as jnp
from jax.experimental import pallas as pl
from jax.experimental.pallas import tpu as pltpu


def _pow_gamma(x, gamma):
    """x >= 0. Specialize common exponents; generic pow = exp(g*log(x)) = 2 EUP passes."""
    if gamma == 0.0:
        return jnp.ones_like(x)
    if gamma == 0.5:
        return jnp.sqrt(x)
    if gamma == 1.0:
        return x
    if gamma == 1.5:
        return x * jnp.sqrt(x)
    if gamma == 2.0:
        return x * x
    return jnp.power(x, gamma)


def _nfl_nce_kernel(pred_ref, labels_ref, out_ref, acc_ref, *,
                    alpha, beta, gamma, n_total, tile_n, tiles_per_core):
    p_idx = pl.program_id(0)          # parallel (per-core) axis
    i = pl.program_id(1)              # reduction axis over this core's tiles

    # Zero this core's accumulator on its first tile.
    @pl.when(i == 0)
    def _():
        acc_ref[...] = jnp.zeros_like(acc_ref)

    logits = pred_ref[...].astype(jnp.float32)            # (T, C)
    labels = labels_ref[...]                               # (T, 1) int32

    # Numerically-stable log-softmax with ONE full-width exp pass, reused for p.
    m = jnp.max(logits, axis=1, keepdims=True)             # (T, 1)
    z = logits - m                                         # (T, C)
    e = jnp.exp(z)                                         # (T, C)  full-width EUP #1
    sum_exp = jnp.sum(e, axis=1, keepdims=True)            # (T, 1)
    log_sum = jnp.log(sum_exp)                             # (T, 1)  tiny EUP
    logp = z - log_sum                                     # (T, C)
    inv_sum = 1.0 / sum_exp                                # (T, 1)  exact (tolerance-safe)
    p = e * inv_sum                                        # (T, C)  reuse of e
    one_minus_p = jnp.maximum(1.0 - p, 0.0)                # clamp rounding ulp

    # log p_y via iota == label masked select (no gather).
    class_ids = jax.lax.broadcasted_iota(jnp.int32, logp.shape, 1)
    is_y = class_ids == labels                             # (T, C)
    logp_y = jnp.sum(jnp.where(is_y, logp, 0.0), axis=1, keepdims=True)  # (T, 1)

    # --- NCE: beta * logp_y / sum_c logp ---
    sum_logp = jnp.sum(logp, axis=1, keepdims=True)        # (T, 1)
    nce = beta * logp_y / sum_logp                         # (T, 1)

    # --- NFL: alpha * (-(1-pt)^g * logp_y) / sum_c(-(1-p)^g * logp) ---
    w = _pow_gamma(one_minus_p, gamma)                     # (T, C)  full-width EUP #2
    normalizor = jnp.sum(-w * logp, axis=1, keepdims=True)  # (T, 1)
    pt = jnp.exp(logp_y)                                   # (T, 1)  tiny EUP
    one_minus_pt = jnp.maximum(1.0 - pt, 0.0)
    nfl = alpha * (-_pow_gamma(one_minus_pt, gamma) * logp_y) / normalizor  # (T, 1)

    per_row = nfl + nce                                    # (T, 1)

    # Mask padded rows (tail of the batch).
    base = (p_idx * tiles_per_core + i) * tile_n
    row_ids = jax.lax.broadcasted_iota(jnp.int32, per_row.shape, 0) + base
    per_row = jnp.where(row_ids < n_total, per_row, 0.0)

    # In-register reduction for this tile; accumulate a single scalar.
    acc_ref[...] += jnp.sum(per_row, keepdims=True)        # (1, 1)

    # Write this core's partial sum once, as a lane-dense (8,128) block.
    @pl.when(i == pl.num_programs(1) - 1)
    def _():
        out_ref[...] = jnp.broadcast_to(acc_ref[...], out_ref.shape)


def _choose_tile_n(n, c, itemsize):
    """Pick tile_n from C and a conservative VMEM budget (safe on v5e/v6e/v7x)."""
    c_pad = -(-c // 128) * 128
    # Budget ~20 MiB: double-buffered pred + labels blocks plus ~5 live (T, c_pad) f32 temps.
    per_row_vmem = c_pad * (2 * itemsize + 5 * 4) + 2 * 128 * 4
    cap = (20 << 20) // per_row_vmem
    # Aim for >= ~2 MiB of real pred payload per block so DMA time >> per-step overhead.
    want = (2 << 20) // max(c * itemsize, 1)
    tile = min(cap, max(want, 8), 8192)
    tile = max(8, (tile // 8) * 8)
    n_pad8 = -(-n // 8) * 8
    return int(min(tile, n_pad8))


def nfl_and_nce(pred, labels, num_classes, alpha=1.0, beta=1.0, gamma=0.5,
                tile_n=None):
    """NFLandNCE loss. pred: (N, C) float, labels: (N,) int. Returns scalar f32."""
    n, c = pred.shape
    assert c == num_classes
    itemsize = jnp.dtype(pred.dtype).itemsize

    if tile_n is None:
        tile_n = _choose_tile_n(n, c, itemsize)
    else:
        tile_n = max(8, (int(tile_n) // 8) * 8)
    n_pad8 = -(-n // 8) * 8
    tile_n = int(min(tile_n, n_pad8))

    # Grid: (parallel cores, tiles per core).  2-way split only pays off on multi-TC chips
    # (v7x / megacore) but is harmless elsewhere, so enable it whenever there is enough work.
    n_tiles = -(-n // tile_n)
    num_par = 2 if n_tiles >= 4 else 1
    n_tiles = -(-n_tiles // num_par) * num_par
    tiles_per_core = n_tiles // num_par
    n_pad = n_tiles * tile_n

    if n_pad != n:
        pred = jnp.pad(pred, ((0, n_pad - n), (0, 0)))
        labels = jnp.pad(labels, (0, n_pad - n))
    labels2d = labels.astype(jnp.int32).reshape(n_pad, 1)

    # Scoped-VMEM limit sized from the actual double-buffered blocks (+ headroom for temps),
    # kept <= 48 MiB so it fits every generation (v7x has 64 MiB physical per TC).
    c_pad = -(-c // 128) * 128
    pred_block_bytes = tile_n * c_pad * itemsize
    labels_block_bytes = tile_n * 128 * 4
    vmem_limit = int(min(max(2 * (pred_block_bytes + labels_block_bytes) + (24 << 20),
                             32 << 20), 48 << 20))

    kernel = functools.partial(
        _nfl_nce_kernel,
        alpha=float(alpha), beta=float(beta), gamma=float(gamma),
        n_total=n, tile_n=tile_n, tiles_per_core=tiles_per_core)

    out = pl.pallas_call(
        kernel,
        out_shape=jax.ShapeDtypeStruct((num_par, 8, 128), jnp.float32),
        grid=(num_par, tiles_per_core),
        in_specs=[
            pl.BlockSpec((tile_n, c), lambda p, i: (p * tiles_per_core + i, 0)),
            pl.BlockSpec((tile_n, 1), lambda p, i: (p * tiles_per_core + i, 0)),
        ],
        out_specs=pl.BlockSpec((1, 8, 128), lambda p, i: (p, 0, 0)),
        scratch_shapes=[pltpu.VMEM((1, 1), jnp.float32)],
        compiler_params=pltpu.CompilerParams(
            dimension_semantics=("parallel", "arbitrary"),
            vmem_limit_bytes=vmem_limit),
    )(pred, labels2d)

    # Per-core partial sums -> mean over the true N (outside the kernel).
    return jnp.sum(out[:, 0, 0]) / jnp.float32(n)


def _reference_nfl_and_nce(pred, labels, num_classes, alpha, beta, gamma):
    logp = jax.nn.log_softmax(pred.astype(jnp.float32), axis=1)
    oh = jax.nn.one_hot(labels, num_classes, dtype=jnp.float32)
    # NormalizedCrossEntropy
    nce = -jnp.sum(oh * logp, axis=1) / (-jnp.sum(logp, axis=1))
    nce = beta * jnp.mean(nce)
    # NormalizedFocalLoss
    p = jnp.exp(logp)
    normalizor = jnp.sum(-1.0 * (1.0 - p) ** gamma * logp, axis=1)
    logp_y = jnp.sum(oh * logp, axis=1)
    pt = jnp.exp(logp_y)
    nfl = -1.0 * (1.0 - pt) ** gamma * logp_y
    nfl = jnp.mean(alpha * nfl / normalizor)
    return nfl + nce


if __name__ == "__main__":
    key = jax.random.PRNGKey(0)
    k1, k2, k3, k4 = jax.random.split(key, 4)

    ALPHA, BETA, GAMMA = 1.0, 1.0, 0.5

    # Case 1: small, single tile.
    N, C = 8, 32
    pred = jax.random.normal(k1, (N, C), dtype=jnp.float32)
    labels = jax.random.randint(k2, (N,), 0, C, dtype=jnp.int32)
    loss = nfl_and_nce(pred, labels, num_classes=C, alpha=ALPHA, beta=BETA, gamma=GAMMA)
    loss = jax.block_until_ready(loss)
    ref = _reference_nfl_and_nce(pred, labels, C, ALPHA, BETA, GAMMA)
    assert jnp.allclose(loss, ref, atol=1e-5, rtol=1e-4), (loss, ref)

    # Case 2: N not a multiple of the tile, multi-tile grid with the 2-way parallel split
    # -> exercises accumulation, per-core partial outputs, and tail-row masking.
    N2, C2 = 70, 16
    pred2 = jax.random.normal(k3, (N2, C2), dtype=jnp.float32)
    labels2 = jax.random.randint(k4, (N2,), 0, C2, dtype=jnp.int32)
    loss2 = nfl_and_nce(pred2, labels2, num_classes=C2, alpha=ALPHA, beta=BETA,
                        gamma=GAMMA, tile_n=16)
    loss2 = jax.block_until_ready(loss2)
    ref2 = _reference_nfl_and_nce(pred2, labels2, C2, ALPHA, BETA, GAMMA)
    assert jnp.allclose(loss2, ref2, atol=1e-5, rtol=1e-4), (loss2, ref2)

    print("KERNEL_OK")
</pallas_src>

<mosaic_0001>
module attributes {stable_mosaic.version = 11 : i64} {
  func.func @_nfl_nce_kernel(%arg0: i32, %arg1: i32, %arg2: memref<8x32xf32, #tpu.memory_space<vmem>>, %arg3: memref<8x1xi32, #tpu.memory_space<vmem>>, %arg4: memref<1x8x128xf32, #tpu.memory_space<vmem>>, %arg5: memref<1x1xf32, #tpu.memory_space<vmem>>) attributes {dimension_semantics = [#tpu.dimension_semantics<parallel>, #tpu.dimension_semantics<arbitrary>], iteration_bounds = array<i64: 1, 1>, scalar_prefetch = 0 : i64, scratch_operands = 1 : i64, tpu.core_type = #tpu.core_type<tc>, window_params = [{transform_indices = @transform_0, window_bounds = array<i64: 8, 32>}, {transform_indices = @transform_1, window_bounds = array<i64: 8, 1>}, {transform_indices = @transform_2, window_bounds = array<i64: 1, 8, 128>}]} {
    %c0_i32 = arith.constant 0 : i32
    %0 = arith.cmpi eq, %arg1, %c0_i32 : i32
    %1 = arith.extui %0 : i1 to i32
    %c0_i32_0 = arith.constant 0 : i32
    %2 = arith.cmpi ne, %1, %c0_i32_0 : i32
    scf.if %2 {
      %cst_27 = arith.constant 0.000000e+00 : f32
      %75 = vector.broadcast %cst_27 : f32 to vector<1x1xf32>
      %c0_28 = arith.constant 0 : index
      %c0_29 = arith.constant 0 : index
      %76 = vector.load %arg5[%c0_28, %c0_29] : memref<1x1xf32, #tpu.memory_space<vmem>>, vector<1x1xf32>
      tpu.vector_store %arg5[%c0_28, %c0_29], %75 {strides = array<i32>} : memref<1x1xf32, #tpu.memory_space<vmem>>, vector<1x1xf32>,
    } else {
    }
    %c0 = arith.constant 0 : index
    %c0_1 = arith.constant 0 : index
    %3 = vector.load %arg2[%c0, %c0_1] : memref<8x32xf32, #tpu.memory_space<vmem>>, vector<8x32xf32>
    %c0_2 = arith.constant 0 : index
    %c0_3 = arith.constant 0 : index
    %4 = vector.load %arg3[%c0_2, %c0_3] : memref<8x1xi32, #tpu.memory_space<vmem>>, vector<8x1xi32>
    %cst = arith.constant dense<0xFF800000> : vector<8xf32>
    %5 = vector.multi_reduction <maximumf>, %3, %cst [1] : vector<8x32xf32> to vector<8xf32>
    %6 = vector.shape_cast %5 : vector<8xf32> to vector<8x1xf32>
    %7 = vector.broadcast %6 : vector<8x1xf32> to vector<8x32xf32>
    %8 = arith.subf %3, %7 : vector<8x32xf32>
    %9 = math.exp %8 : vector<8x32xf32>
    %cst_4 = arith.constant dense<0.000000e+00> : vector<8xf32>
    %10 = vector.multi_reduction <add>, %9, %cst_4 [1] : vector<8x32xf32> to vector<8xf32>
    %11 = vector.shape_cast %10 : vector<8xf32> to vector<8x1xf32>
    %12 = math.log %11 : vector<8x1xf32>
    %13 = vector.broadcast %12 : vector<8x1xf32> to vector<8x32xf32>
    %14 = arith.subf %8, %13 : vector<8x32xf32>
    %cst_5 = arith.constant 1.000000e+00 : f32
    %15 = vector.broadcast %cst_5 : f32 to vector<8x1xf32>
    %16 = arith.divf %15, %11 : vector<8x1xf32>
    %17 = vector.broadcast %16 : vector<8x1xf32> to vector<8x32xf32>
    %18 = arith.mulf %9, %17 : vector<8x32xf32>
    %cst_6 = arith.constant 1.000000e+00 : f32
    %19 = vector.broadcast %cst_6 : f32 to vector<8x32xf32>
    %20 = arith.subf %19, %18 : vector<8x32xf32>
    %cst_7 = arith.constant 0.000000e+00 : f32
    %21 = vector.broadcast %cst_7 : f32 to vector<8x32xf32>
    %22 = arith.maximumf %20, %21 : vector<8x32xf32>
    %23 = tpu.iota {dimensions = array<i32: 1>} : vector<8x32xi32>
    %24 = vector.broadcast %4 : vector<8x1xi32> to vector<8x32xi32>
    %25 = arith.cmpi eq, %23, %24 : vector<8x32xi32>
    %cst_8 = arith.constant 0.000000e+00 : f32
    %26 = vector.broadcast %cst_8 : f32 to vector<8x32xf32>
    %27 = arith.select %25, %14, %26 : vector<8x32xi1>, vector<8x32xf32>
    %cst_9 = arith.constant dense<0.000000e+00> : vector<8xf32>
    %28 = vector.multi_reduction <add>, %27, %cst_9 [1] : vector<8x32xf32> to vector<8xf32>
    %29 = vector.shape_cast %28 : vector<8xf32> to vector<8x1xf32>
    %cst_10 = arith.constant dense<0.000000e+00> : vector<8xf32>
    %30 = vector.multi_reduction <add>, %14, %cst_10 [1] : vector<8x32xf32> to vector<8xf32>
    %31 = vector.shape_cast %30 : vector<8xf32> to vector<8x1xf32>
    %cst_11 = arith.constant 1.000000e+00 : f32
    %32 = vector.broadcast %cst_11 : f32 to vector<8x1xf32>
    %33 = arith.mulf %32, %29 : vector<8x1xf32>
    %34 = arith.divf %33, %31 : vector<8x1xf32>
    %35 = math.sqrt %22 : vector<8x32xf32>
    %cst_12 = arith.constant 0.000000e+00 : f32
    %36 = vector.broadcast %cst_12 : f32 to vector<8x32xf32>
    %37 = arith.subf %36, %35 : vector<8x32xf32>
    %38 = arith.mulf %37, %14 : vector<8x32xf32>
    %cst_13 = arith.constant dense<0.000000e+00> : vector<8xf32>
    %39 = vector.multi_reduction <add>, %38, %cst_13 [1] : vector<8x32xf32> to vector<8xf32>
    %40 = vector.shape_cast %39 : vector<8xf32> to vector<8x1xf32>
    %41 = math.exp %29 : vector<8x1xf32>
    %cst_14 = arith.constant 1.000000e+00 : f32
    %42 = vector.broadcast %cst_14 : f32 to vector<8x1xf32>
    %43 = arith.subf %42, %41 : vector<8x1xf32>
    %cst_15 = arith.constant 0.000000e+00 : f32
    %44 = vector.broadcast %cst_15 : f32 to vector<8x1xf32>
    %45 = arith.maximumf %43, %44 : vector<8x1xf32>
    %46 = math.sqrt %45 : vector<8x1xf32>
    %cst_16 = arith.constant 0.000000e+00 : f32
    %47 = vector.broadcast %cst_16 : f32 to vector<8x1xf32>
    %48 = arith.subf %47, %46 : vector<8x1xf32>
    %49 = arith.mulf %48, %29 : vector<8x1xf32>
    %cst_17 = arith.constant 1.000000e+00 : f32
    %50 = vector.broadcast %cst_17 : f32 to vector<8x1xf32>
    %51 = arith.mulf %50, %49 : vector<8x1xf32>
    %52 = arith.divf %51, %40 : vector<8x1xf32>
    %53 = arith.addf %52, %34 : vector<8x1xf32>
    %c1_i32 = arith.constant 1 : i32
    %54 = arith.muli %arg0, %c1_i32 : i32
    %55 = arith.addi %54, %arg1 : i32
    %c8_i32 = arith.constant 8 : i32
    %56 = arith.muli %55, %c8_i32 : i32
    %57 = tpu.iota {dimensions = array<i32: 0>} : vector<8x1xi32>
    %58 = vector.broadcast %56 : i32 to vector<8x1xi32>
    %59 = arith.addi %57, %58 : vector<8x1xi32>
    %c8_i32_18 = arith.constant 8 : i32
    %60 = vector.broadcast %c8_i32_18 : i32 to vector<8x1xi32>
    %61 = arith.cmpi slt, %59, %60 : vector<8x1xi32>
    %cst_19 = arith.constant 0.000000e+00 : f32
    %62 = vector.broadcast %cst_19 : f32 to vector<8x1xf32>
    %63 = arith.select %61, %53, %62 : vector<8x1xi1>, vector<8x1xf32>
    %c0_20 = arith.constant 0 : index
    %c0_21 = arith.constant 0 : index
    %64 = vector.load %arg5[%c0_20, %c0_21] : memref<1x1xf32, #tpu.memory_space<vmem>>, vector<1x1xf32>
    %65 = vector.shape_cast %63 : vector<8x1xf32> to vector<1x8x1xf32>
    %cst_22 = arith.constant dense<0.000000e+00> : vector<1xf32>
    %66 = vector.multi_reduction <add>, %65, %cst_22 [1, 2] : vector<1x8x1xf32> to vector<1xf32>
    %67 = vector.shape_cast %66 : vector<1xf32> to vector<1x1x1xf32>
    %68 = vector.extract %67[0, 0, 0] : f32 from vector<1x1x1xf32>
    %69 = vector.broadcast %68 : f32 to vector<1x1xf32>
    %70 = arith.addf %64, %69 : vector<1x1xf32>
    %c0_23 = arith.constant 0 : index
    %c0_24 = arith.constant 0 : index
    %71 = vector.load %arg5[%c0_23, %c0_24] : memref<1x1xf32, #tpu.memory_space<vmem>>, vector<1x1xf32>
    tpu.vector_store %arg5[%c0_23, %c0_24], %70 {strides = array<i32>} : memref<1x1xf32, #tpu.memory_space<vmem>>, vector<1x1xf32>,
    %c0_i32_25 = arith.constant 0 : i32
    %72 = arith.cmpi eq, %arg1, %c0_i32_25 : i32
    %73 = arith.extui %72 : i1 to i32
    %c0_i32_26 = arith.constant 0 : i32
    %74 = arith.cmpi ne, %73, %c0_i32_26 : i32
    scf.if %74 {
      %c0_27 = arith.constant 0 : index
      %c0_28 = arith.constant 0 : index
      %75 = vector.load %arg5[%c0_27, %c0_28] : memref<1x1xf32, #tpu.memory_space<vmem>>, vector<1x1xf32>
      %76 = vector.shape_cast %75 : vector<1x1xf32> to vector<1x1x1xf32>
      %77 = vector.broadcast %76 : vector<1x1x1xf32> to vector<1x8x128xf32>
      %c0_29 = arith.constant 0 : index
      %c0_30 = arith.constant 0 : index
      %c0_31 = arith.constant 0 : index
      %78 = vector.load %arg4[%c0_29, %c0_30, %c0_31] : memref<1x8x128xf32, #tpu.memory_space<vmem>>, vector<1x8x128xf32>
      tpu.vector_store %arg4[%c0_29, %c0_30, %c0_31], %77 {strides = array<i32>} : memref<1x8x128xf32, #tpu.memory_space<vmem>>, vector<1x8x128xf32>,
    } else {
    }
    return
  }
  func.func @transform_0(%arg0: i32, %arg1: i32) -> (i32, i32) {
    %c1_i32 = arith.constant 1 : i32
    %0 = arith.muli %arg0, %c1_i32 : i32
    %1 = arith.addi %0, %arg1 : i32
    %c0_i32 = arith.constant 0 : i32
    %c0_i32_0 = arith.constant 0 : i32
    return %1, %c0_i32 : i32, i32
  }
  func.func @transform_1(%arg0: i32, %arg1: i32) -> (i32, i32) {
    %c1_i32 = arith.constant 1 : i32
    %0 = arith.muli %arg0, %c1_i32 : i32
    %1 = arith.addi %0, %arg1 : i32
    %c0_i32 = arith.constant 0 : i32
    %c0_i32_0 = arith.constant 0 : i32
    return %1, %c0_i32 : i32, i32
  }
  func.func @transform_2(%arg0: i32, %arg1: i32) -> (i32, i32, i32) {
    %c0_i32 = arith.constant 0 : i32
    %c0_i32_0 = arith.constant 0 : i32
    %c0_i32_1 = arith.constant 0 : i32
    return %arg0, %c0_i32, %c0_i32_0 : i32, i32, i32
  }
}

</mosaic_0001>

<bundles_post_ra>
// kernel: tpu_custom_call.1
= control target key start
LH: loop header
LB: loop body
LE: loop exit
PB: predicated region body
PF: predicated region fallthrough
CT: control target
= control target key end

     0   :  { %vm54_vm0 = vcmask 261120   ;;  %s268_s0 = inlined_call_operand.vmem [shape: f32[8,32], index: 0, kind: input, shape index: {}]   ;;  %s269_s1 = inlined_call_operand.vmem [shape: s32[8,1], index: 1, kind: input, shape index: {}]   ;;  %s270_s2 = inlined_call_operand.hbm [shape: f32[1,8,128], index: 2, kind: output, shape index: {}]  }
   0x1   :  { %v52_v0 = vld [vmem:[%s268_s0] sm:$0xff] }
   0x2   :  { %7 = vsyncpa [#allocation4], 0  ;;  %v55_v1 = vsel %vm54_vm0, %v52_v0, -inf  ;;  %v53_v2 = vld [vmem:[%s269_s1] sm:$0xff]  ;;  %v227_v3 = vmov 0   ;;  %v72_v10 = vlaneseq  ;;  %vm124_vm6 = vcmask 7168  }
   0x3   :  { %56 = vmax.xlane.f32.xlu0 %v55_v1  ;;  %185 = vset.pattern.permute.xlu1 %v227_v3  ;;  %vm50_vm7 = vcmask 0   ;;  %v228_v51 = vmov 0.0   ;;  %s229_s1 = smov [#allocation3]  }
   0x4   :  { %186 = vset.pattern.permute.xlu0 %v227_v3  ;;  %75 = vperm.xlu1 %185, %v53_v2   ;;  %v73_v11 = vand.u32 127, %v72_v10  ;;  %51 = vst.msk [vmem:[#allocation2] sm:$0x1] %vm50_vm7, %v228_v51  ;;  %s159_s13 = sshll.u32 %s229_s1, 4  ;;  %s160_s13 = int_to_ptr.vmem [resolvable:$true] %s159_s13 }
   0x5   :  { %s203_s14 = scalar_lea.vmem %s160_s13, 128  ;;  %p208_p1 = scmp.lt.s32.totalorder %s160_s13, %s160_s13 }
   0x6   :  { %p204_p0 = scmp.ne.s32.totalorder %s160_s13, %s203_s14  ;;  %p209_p2 = scmp.lt.s32.totalorder %s203_s14, %s203_s14 }
   0x8   :  { %p210_p3 = por %p209_p2, %p208_p1 }
   0xa   :  { %p211_p4 = pnand %p210_p3, %p204_p0 }
   0xb   :  { %v123_v59 = vld [vmem:[#allocation2] sm:$0x1] }
  0x83   :  { %v76_v12 = vpop.permute.xlu1 %75 }
  0x84   :  { %vm77_vm1 = vcmp.eq.s32.totalorder %v73_v11, %v76_v12 }
  0x90   :  { %v57_v4 = vpop.xlane.xlu0 %56 }
  0x91   :  { %v58_v5 = vsub.f32 %v52_v0, %v57_v4 }
  0x93   :  { %v59_v6 = vmul.f32 1.442695, %v58_v5 }
  0x95   :  { %187 = vpow2.f32 %v59_v6 }
  0x9f   :  { %v188_v7 = vpop.eup %187 }
  0xa0   :  { %v61_v8 = vsel %vm54_vm0, %v188_v7, 0.0 }
  0xa1   :  { %62 = vadd.xlane.f32.xlu0 %v61_v8 }
 0x12e   :  { %v63_v9 = vpop.xlane.xlu0 %62 }
 0x12f   :  { %189 = vlog2.f32 %v63_v9 }
 0x130   :  { %191 = vrcp.f32 %v63_v9 }
 0x139   :  { %v190_v13 = vpop.eup %189 }
 0x13a   :  { %v192_v14 = vpop.eup %191  ;;  %v65_v15 = vmul.f32 0.6931472, %v190_v13 }
 0x13b   :  { %v69_v16 = vmul.f32 %v192_v14, %v188_v7 }
 0x13c   :  { %v66_v17 = vsub.f32 %v58_v5, %v65_v15 }
 0x13d   :  { %v70_v18 = vsub.f32 1.0, %v69_v16 }
 0x13e   :  { %v82_v19 = vsel %vm54_vm0, %v66_v17, 0.0  ;;  %v78_v20 = vsel %vm77_vm1, %v66_v17, 0.0 }
 0x13f   :  { %v71_v21 = vmax.f32 %v70_v18, 0.0  ;;  %83 = vadd.xlane.f32.xlu0 %v82_v19  ;;  %v79_v22 = vsel %vm54_vm0, %v78_v20, 0.0 }
 0x140   :  { %80 = vadd.xlane.f32.xlu1 %v79_v22 }
 0x141   :  { %193 = vrsqrt.f32 %v71_v21  ;;  %vm89_vm2 = vcmp.eq.f32.partialorder %v71_v21, inf  ;;  %v92_v25 = vand.u32 2147483648, %v71_v21  ;;  %vm91_vm3 = vcmp.eq.f32.partialorder %v71_v21, 0.0 }
 0x14b   :  { %v194_v23 = vpop.eup %193 }
 0x14c   :  { %v88_v24 = vmul.f32 %v194_v23, %v71_v21 }
 0x14e   :  { %v90_v26 = vsel %vm89_vm2, %v71_v21, %v88_v24 }
 0x14f   :  { %v93_v27 = vsel %vm91_vm3, %v92_v25, %v90_v26 }
 0x150   :  { %v94_v28 = vsub.f32 0.0, %v93_v27 }
 0x152   :  { %v95_v29 = vmul.f32 %v94_v28, %v66_v17 }
 0x154   :  { %v96_v30 = vsel %vm54_vm0, %v95_v29, 0.0 }
 0x155   :  { %97 = vadd.xlane.f32.xlu0 %v96_v30 }
 0x1cc   :  { %v84_v36 = vpop.xlane.xlu0 %83 }
 0x1cd   :  { %v81_v31 = vpop.xlane.xlu1 %80 }
 0x1ce   :  { %v99_v32 = vmul.f32 1.442695, %v81_v31 }
 0x1d0   :  { %195 = vpow2.f32 %v99_v32 }
 0x1da   :  { %v196_v33 = vpop.eup %195 }
 0x1db   :  { %v101_v34 = vsub.f32 1.0, %v196_v33 }
 0x1dd   :  { %v102_v35 = vmax.f32 %v101_v34, 0.0 }
 0x1df   :  { %197 = vrsqrt.f32 %v102_v35  ;;  %vm105_vm4 = vcmp.eq.f32.partialorder %v102_v35, inf  ;;  %v108_v40 = vand.u32 2147483648, %v102_v35  ;;  %vm107_vm5 = vcmp.eq.f32.partialorder %v102_v35, 0.0 }
 0x1e0   :  { %199 = vrcp.f32 %v84_v36 }
 0x1e2   :  { %v98_v37 = vpop.xlane.xlu0 %97 }
 0x1e3   :  { %201 = vrcp.f32 %v98_v37 }
 0x1e9   :  { %v198_v38 = vpop.eup %197 }
 0x1ea   :  { %v104_v39 = vmul.f32 %v198_v38, %v102_v35  ;;  %v200_v44 = vpop.eup %199 }
 0x1eb   :  { %v86_v47 = vmul.f32 %v200_v44, %v81_v31 }
 0x1ec   :  { %v106_v41 = vsel %vm105_vm4, %v102_v35, %v104_v39 }
 0x1ed   :  { %v109_v42 = vsel %vm107_vm5, %v108_v40, %v106_v41  ;;  %v202_v46 = vpop.eup %201 }
 0x1ee   :  { %v110_v43 = vsub.f32 0.0, %v109_v42 }
 0x1f0   :  { %v111_v45 = vmul.f32 %v110_v43, %v81_v31 }
 0x1f2   :  { %v113_v48 = vmul.f32 %v202_v46, %v111_v45 }
 0x1f4   :  { %v114_v49 = vadd.f32 %v113_v48, %v86_v47 }
 0x1f6   :  { %v125_v50 = vsel %vm124_vm6, %v114_v49, 0.0 }
 0x1f7   :  { %126 = vadd.xlane.f32.xlu0 %v125_v50 }
 0x284   :  { %v127_v52 = vpop.xlane.xlu0 %126 }
 0x285   :  { %v128_v53 = vrot.slane %v127_v52, 4 }
 0x287   :  { %v129_v54 = vadd.f32 %v128_v53, %v127_v52 }
 0x289   :  { %v130_v55 = vrot.slane %v129_v54, 2 }
 0x28b   :  { %v131_v56 = vadd.f32 %v130_v55, %v129_v54 }
 0x28d   :  { %v132_v57 = vrot.slane %v131_v56, 1 }
 0x28f   :  { %v133_v58 = vadd.f32 %v132_v57, %v131_v56 }
 0x291   :  { %180 = vpush %v133_v58 }
 0x2c2   :  { %s181_s0 = spop %180 }
 0x2c3   :  { %v135_v60 = vstv %s181_s0 }
 0x2c4   :  { %v136_v61 = vadd.f32 %v135_v60, %v123_v59 }
 0x2c6   :  { %138 = vst.msk [vmem:[#allocation2] sm:$0x1] %vm50_vm7, %v136_v61 }
 0x2cd   :  { %v179_v62 = vld [vmem:[#allocation2] ss:$0 sm:$0xff] }
 0x2ce   :  { %149 = vperm.xlu0 %186, %v179_v62  }
 0x34d   :  { %v150_v63 = vpop.permute.xlu0 %149 }
 0x34e   :  { %152 = vst [vmem:[#allocation3] sm:$0xff] %v150_v63 }
 0x34f   :  { %214 = shalt.err (!%p211_p4)
}
 0x350   :  { %s215_s17 = scalar_lea.hbm %s270_s2, 128 }
 0x351   :  { %p216_p5 = scmp.ne.s32.totalorder %s270_s2, %s215_s17  ;;  %p219_p6 = scmp.lt.u32.totalorder %s215_s17, %s270_s2 }
 0x353   :  { %p221_p7 = pnand %p219_p6, %p216_p5 }
 0x355   :  { %224 = shalt.err (!%p221_p7)
}
 0x356   :  { %162 = dma.vmem_to_hbm [thread:$0]  %s160_s13, 128, %s270_s2, [#allocation4]  }
 0x357   :  { %225 = dma.done.wait [#allocation4], 128  }
 0x358   :  { %226 = vsyncadd [#allocation4], 4294967168 }
 0x359   :  { %166 = vsyncpa [#allocation4], 1 }

</bundles_post_ra>
